<compile_context>
chip_gen: v7x
topology: tpu7x:2x2x1
jax: 0.10.0
libtpu: 0.0.40
codegen_flags: <defaults>
</compile_context>

<pallas_src>
import functools

import jax
import jax.numpy as jnp
from jax.experimental import pallas as pl
from jax.experimental.pallas import tpu as pltpu  # noqa: F401  (TPU backend)


def _shape_kernel(grid_ref, kc_ref, sp_ref, w_ref, *, normalize):
    # grid_ref: (2, K2)  row 0 = grid_x, row 1 = grid_y   (pixels on lanes)
    # kc_ref:   (N, 2)   col 0 = kernel_x, col 1 = kernel_y
    # sp_ref:   (P, N)   row 0 = per-shape sigma
    # w_ref:    (K2, N)  output, PyTorch (pixels, shapes) layout
    gx = grid_ref[0:1, :]            # (1, K2)   static slices: free
    gy = grid_ref[1:2, :]            # (1, K2)
    kx = kc_ref[:, 0:1]              # (N, 1)
    ky = kc_ref[:, 1:2]              # (N, 1)

    # Squared distances, computed lane-dense: (N, K2) with K2 on lanes.
    dx = kx - gx
    dy = ky - gy
    rr = dx * dx + dy * dy           # (N, K2), sign of dx/dy irrelevant

    # Single in-kernel transpose to the output layout (no extra XLA dispatch).
    # N is a multiple of 8 (sublanes), K2 a multiple of 128 (lanes).
    rr_t = jnp.transpose(rr)         # (K2, N)

    # Per-shape reciprocal of the Gaussian denominator on a tiny (1, N)
    # vector, kept exact because it sits inside exp().
    sig = sp_ref[0:1, :]             # (1, N)
    neg_inv = -pl.reciprocal(2.0 * sig * sig, approx=False)   # (1, N)

    w = jnp.exp(rr_t * neg_inv)      # Gaussian shape_function, (K2, N)

    if normalize:
        # L2 norm over the pixel axis == W.norm(dim=0, keepdim=True).
        # One exact EUP rsqrt instead of sqrt + reciprocal.
        w = w * jax.lax.rsqrt(jnp.sum(w * w, axis=0, keepdims=True))

    w_ref[...] = w


def shape_forward(kernel_centers, grid, shape_params, normalize=True):
    """Pallas equivalent of Shape.forward.

    kernel_centers: (N, 2) float32
    grid:           (2, K2) float32, packed once at init (row0=x, row1=y)
    shape_params:   (P, N) float32 (row 0 = per-shape sigma)
    returns W:      (K2, N) float32
    """
    k2 = grid.shape[1]
    n = kernel_centers.shape[0]
    p = shape_params.shape[0]

    kc = kernel_centers if kernel_centers.dtype == jnp.float32 \
        else kernel_centers.astype(jnp.float32)
    sp = shape_params if shape_params.dtype == jnp.float32 \
        else shape_params.astype(jnp.float32)

    # Keep the shapes axis a multiple of 8 sublanes (full vregs). Padded
    # columns use center=0 / sigma=1 (benign) and are sliced off after.
    n_pad = ((n + 7) // 8) * 8
    if n_pad != n:
        kc = jnp.pad(kc, ((0, n_pad - n), (0, 0)))
        sp = jnp.pad(sp, ((0, 0), (0, n_pad - n)), constant_values=1.0)

    kernel = functools.partial(_shape_kernel, normalize=normalize)

    w = pl.pallas_call(
        kernel,
        out_shape=jax.ShapeDtypeStruct((k2, n_pad), jnp.float32),
        in_specs=[
            pl.BlockSpec((2, k2), lambda: (0, 0)),
            pl.BlockSpec((n_pad, 2), lambda: (0, 0)),
            pl.BlockSpec((p, n_pad), lambda: (0, 0)),
        ],
        out_specs=pl.BlockSpec((k2, n_pad), lambda: (0, 0)),
    )(grid, kc, sp)

    if n_pad != n:
        w = w[:, :n]
    return w


def make_shape_module(kernel_size, initial_parameters, num_shapes, n_colors, key):
    """Deterministic re-implementation of Shape.__init__ parameter setup.

    The static pixel grid is packed here ONCE as a (2, K2) f32 buffer so the
    forward pass performs no per-call packing of constants.
    """
    x = jnp.arange(kernel_size, dtype=jnp.float32)
    y = jnp.arange(kernel_size, dtype=jnp.float32)
    gx, gy = jnp.meshgrid(x, y, indexing="ij")   # matches torch.meshgrid default
    grid = jnp.stack([gx.reshape(-1), gy.reshape(-1)], axis=0)   # (2, K2)

    init = jnp.asarray(initial_parameters, dtype=jnp.float32)
    params_pre = jnp.tile(init, n_colors)                        # (P*n_colors,)
    params = jnp.repeat(params_pre[:, None], num_shapes, 1)      # (P*n_colors, N)
    noise = 0.1 * jax.random.normal(key, params.shape, dtype=jnp.float32)
    shape_params = params + noise
    return grid, shape_params


def shape_forward_ref(kernel_centers, grid, shape_params, normalize=True):
    """Pure-JAX reference mirroring the PyTorch forward (Gaussian shape_function)."""
    gx = grid[0]
    gy = grid[1]
    kx = kernel_centers[:, 0]
    ky = kernel_centers[:, 1]
    dx = kx[None, :] - gx[:, None]
    dy = ky[None, :] - gy[:, None]
    rr = dx ** 2 + dy ** 2
    sig = shape_params[0, :][None, :]
    w = jnp.exp(-rr / (2.0 * sig * sig))
    if normalize:
        w = w / jnp.linalg.norm(w, axis=0, keepdims=True)
    return w


if __name__ == "__main__":
    kernel_size = 16          # grid is kernel_size x kernel_size -> K2 = 256 pixels
    num_shapes = 8            # multiple of 8 sublanes (full vregs)
    n_colors = 1
    initial_parameters = [3.0]  # one sigma per color

    key = jax.random.PRNGKey(0)
    k_params, k_centers = jax.random.split(key)

    grid, shape_params = make_shape_module(
        kernel_size, initial_parameters, num_shapes, n_colors, k_params
    )

    # kernel_centers: (num_shapes, 2), positions inside the kernel grid
    kernel_centers = jax.random.uniform(
        k_centers, (num_shapes, 2), dtype=jnp.float32,
        minval=0.0, maxval=float(kernel_size - 1),
    )

    W = shape_forward(kernel_centers, grid, shape_params, normalize=True)
    W = jax.block_until_ready(W)

    W_ref = shape_forward_ref(kernel_centers, grid, shape_params, normalize=True)
    assert W.shape == (kernel_size * kernel_size, num_shapes)
    assert jnp.allclose(W, W_ref, atol=1e-5, rtol=1e-5)

    print("KERNEL_OK")
</pallas_src>

<mosaic_0001>
module attributes {stable_mosaic.version = 11 : i64} {
  func.func @_shape_kernel(%arg0: memref<2x256xf32, #tpu.memory_space<vmem>>, %arg1: memref<8x2xf32, #tpu.memory_space<vmem>>, %arg2: memref<1x8xf32, #tpu.memory_space<vmem>>, %arg3: memref<256x8xf32, #tpu.memory_space<vmem>>) attributes {dimension_semantics = [], scalar_prefetch = 0 : i64, scratch_operands = 0 : i64, tpu.core_type = #tpu.core_type<tc>} {
    %c0 = arith.constant 0 : index
    %c0_0 = arith.constant 0 : index
    %0 = vector.load %arg0[%c0, %c0_0] : memref<2x256xf32, #tpu.memory_space<vmem>>, vector<1x256xf32>
    %c1 = arith.constant 1 : index
    %c0_1 = arith.constant 0 : index
    %1 = vector.load %arg0[%c1, %c0_1] : memref<2x256xf32, #tpu.memory_space<vmem>>, vector<1x256xf32>
    %c0_2 = arith.constant 0 : index
    %c0_3 = arith.constant 0 : index
    %2 = vector.load %arg1[%c0_2, %c0_3] : memref<8x2xf32, #tpu.memory_space<vmem>>, vector<8x1xf32>
    %c0_4 = arith.constant 0 : index
    %c1_5 = arith.constant 1 : index
    %3 = vector.load %arg1[%c0_4, %c1_5] : memref<8x2xf32, #tpu.memory_space<vmem>>, vector<8x1xf32>
    %4 = vector.broadcast %2 : vector<8x1xf32> to vector<8x256xf32>
    %5 = vector.broadcast %0 : vector<1x256xf32> to vector<8x256xf32>
    %6 = arith.subf %4, %5 : vector<8x256xf32>
    %7 = vector.broadcast %3 : vector<8x1xf32> to vector<8x256xf32>
    %8 = vector.broadcast %1 : vector<1x256xf32> to vector<8x256xf32>
    %9 = arith.subf %7, %8 : vector<8x256xf32>
    %10 = arith.mulf %6, %6 : vector<8x256xf32>
    %11 = arith.mulf %9, %9 : vector<8x256xf32>
    %12 = arith.addf %10, %11 : vector<8x256xf32>
    %13 = tpu.transpose %12, [1, 0] : vector<8x256xf32> -> vector<256x8xf32>
    %c0_6 = arith.constant 0 : index
    %c0_7 = arith.constant 0 : index
    %14 = vector.load %arg2[%c0_6, %c0_7] : memref<1x8xf32, #tpu.memory_space<vmem>>, vector<1x8xf32>
    %cst = arith.constant 2.000000e+00 : f32
    %15 = vector.broadcast %cst : f32 to vector<1x8xf32>
    %16 = arith.mulf %15, %14 : vector<1x8xf32>
    %17 = arith.mulf %16, %14 : vector<1x8xf32>
    %18 = tpu.reciprocal %17 : vector<1x8xf32> -> vector<1x8xf32>
    %cst_8 = arith.constant 0.000000e+00 : f32
    %19 = vector.broadcast %cst_8 : f32 to vector<1x8xf32>
    %20 = arith.subf %19, %18 : vector<1x8xf32>
    %21 = vector.broadcast %20 : vector<1x8xf32> to vector<256x8xf32>
    %22 = arith.mulf %13, %21 : vector<256x8xf32>
    %23 = math.exp %22 : vector<256x8xf32>
    %24 = arith.mulf %23, %23 : vector<256x8xf32>
    %cst_9 = arith.constant dense<0.000000e+00> : vector<8xf32>
    %25 = vector.multi_reduction <add>, %24, %cst_9 [0] : vector<256x8xf32> to vector<8xf32>
    %26 = vector.shape_cast %25 : vector<8xf32> to vector<1x8xf32>
    %27 = math.rsqrt %26 : vector<1x8xf32>
    %28 = vector.broadcast %27 : vector<1x8xf32> to vector<256x8xf32>
    %29 = arith.mulf %23, %28 : vector<256x8xf32>
    %c0_10 = arith.constant 0 : index
    %c0_11 = arith.constant 0 : index
    %30 = vector.load %arg3[%c0_10, %c0_11] : memref<256x8xf32, #tpu.memory_space<vmem>>, vector<256x8xf32>
    tpu.vector_store %arg3[%c0_10, %c0_11], %29 {strides = array<i32>} : memref<256x8xf32, #tpu.memory_space<vmem>>, vector<256x8xf32>,
    return
  }
}

</mosaic_0001>

<bundles_post_ra>
// kernel: tpu_custom_call.1
= control target key start
LH: loop header
LB: loop body
LE: loop exit
PB: predicated region body
PF: predicated region fallthrough
CT: control target
= control target key end

     0   :  { %v475_v0 = vmov 0   ;;  %v476_v2 = vmov 1   ;;  %v24_v3 = vlaneseq  ;;  %vm262_vm0 = vcmask 64512   ;;  %s863_s1 = inlined_call_operand.vmem [shape: f32[8,2], index: 1, kind: input, shape index: {}]   ;;  %s864_s0 = inlined_call_operand.vmem [shape: f32[2,256], index: 0, kind: input, shape index: {}]   ;;  %s865_s2 = inlined_call_operand.vmem [shape: f32[1,8], index: 2, kind: input, shape index: {}]   ;;  %s866_s3 = inlined_call_operand.vmem [shape: f32[256,8], index: 3, kind: output, shape index: {}]  }
   0x1   :  { %405 = vset.pattern.permute.xlu0 %v475_v0  ;;  %v17_v1 = vld [vmem:[%s863_s1] sm:$0xff] }
   0x2   :  { %20 = vperm.xlu0 %405, %v17_v1   ;;  %v25_v4 = vshrl.u32 %v24_v3, 7  ;;  %v14_v6 = vld [vmem:[%s864_s0] ss:$2 sm:$0x3] }
   0x3   :  { %v401_v7 = vld [vmem:[%s864_s0 + $0x1] ss:$2 sm:$0x3]  ;;  %v123_v31 = vld [vmem:[%s865_s2] sm:$0x1] }
   0x4   :  { %v26_v5 = vsub.s32 0, %v25_v4  ;;  %v30_v17 = vsub.s32 1, %v25_v4  ;;  %v124_v33 = vmul.f32 2.0, %v123_v31 }
   0x6   :  { %406 = vset.pattern.permute.xlu0 %v476_v2  ;;  %v27_v9 = vrot.slane %v14_v6, %v26_v5  ;;  %v44_v10 = vrot.slane %v401_v7, %v26_v5  ;;  %v48_v18 = vrot.slane %v401_v7, %v30_v17  ;;  %v31_v19 = vrot.slane %v14_v6, %v30_v17 }
   0x7   :  { %37 = vperm.xlu0 %406, %v17_v1   ;;  %v125_v35 = vmul.f32 %v124_v33, %v123_v31 }
   0x9   :  { %407 = vrcp.f32 %v125_v35 }
  0x13   :  { %v408_v40 = vpop.eup %407 }
  0x14   :  { %v127_v41 = vsub.f32 0.0, %v408_v40 }
  0x16   :  { %v509_v43 = vrot.slane %v127_v41, %v26_v5 }
  0x81   :  { %v21_v8 = vpop.permute.xlu0 %20 }
  0x82   :  { %v34_v11 = vsub.f32 %v21_v8, %v27_v9  ;;  %v35_v21 = vsub.f32 %v21_v8, %v31_v19 }
  0x84   :  { %v53_v15 = vmul.f32 %v34_v11, %v34_v11  ;;  %v54_v23 = vmul.f32 %v35_v21, %v35_v21 }
  0x86   :  { %v38_v12 = vpop.permute.xlu0 %37 }
  0x87   :  { %v51_v13 = vsub.f32 %v38_v12, %v44_v10  ;;  %v52_v20 = vsub.f32 %v38_v12, %v48_v18 }
  0x89   :  { %v55_v14 = vmul.f32 %v51_v13, %v51_v13  ;;  %v56_v22 = vmul.f32 %v52_v20, %v52_v20 }
  0x8b   :  { %v57_v16 = vadd.f32 %v55_v14, %v53_v15  ;;  %v58_v24 = vadd.f32 %v56_v22, %v54_v23 }
  0x8d   :  { %59 = vxpose.xlu1.b32.start.end [1/1] (short) %v57_v16, 128 }
  0xca   :  { %91 = vxpose.xlu1.b32.start.end [1/1] (short) %v58_v24, 128 }
 0x10d   :  { %v75_v25 = vpop.trf.xlu1 }
 0x10e   :  { %v134_v46 = vmul.f32 %v509_v43, %v75_v25 }
 0x110   :  { %v166_v51 = vmul.f32 1.442695, %v134_v46 }
 0x111   :  { %v76_v26 = vpop.trf.xlu1 }
 0x112   :  { %v135_v45 = vmul.f32 %v509_v43, %v76_v26 }
 0x114   :  { %v168_v49 = vmul.f32 1.442695, %v135_v45 }
 0x115   :  { %v77_v27 = vpop.trf.xlu1 }
 0x116   :  { %v136_v48 = vmul.f32 %v509_v43, %v77_v27  ;;  %409 = vpow2.f32 %v168_v49 }
 0x117   :  { %411 = vpow2.f32 %v166_v51 }
 0x118   :  { %v170_v53 = vmul.f32 1.442695, %v136_v48 }
 0x119   :  { %v78_v28 = vpop.trf.xlu1 }
 0x11a   :  { %v137_v50 = vmul.f32 %v509_v43, %v78_v28  ;;  %413 = vpow2.f32 %v170_v53 }
 0x11c   :  { %v172_v55 = vmul.f32 1.442695, %v137_v50 }
 0x11d   :  { %v79_v29 = vpop.trf.xlu1 }
 0x11e   :  { %v138_v54 = vmul.f32 %v509_v43, %v79_v29  ;;  %415 = vpow2.f32 %v172_v55 }
 0x120   :  { %v174_v58 = vmul.f32 1.442695, %v138_v54  ;;  %v521_v4 = vpop.eup %409 }
 0x121   :  { %v80_v30 = vpop.trf.xlu1  ;;  %v524_v7 = vpop.eup %411  ;;  %v231_v11 = vmul.f32 %v521_v4, %v521_v4 }
 0x122   :  { %v139_v56 = vmul.f32 %v509_v43, %v80_v30  ;;  %417 = vpow2.f32 %v174_v58  ;;  %v230_v16 = vmul.f32 %v524_v7, %v524_v7 }
 0x123   :  { %v264_v21 = vsel %vm262_vm0, %v231_v11, 0.0 }
 0x124   :  { %v176_v60 = vmul.f32 1.442695, %v139_v56  ;;  %v526_v8 = vpop.eup %413  ;;  %v263_v27 = vsel %vm262_vm0, %v230_v16, 0.0 }
 0x125   :  { %v81_v32 = vpop.trf.xlu1  ;;  %v232_v17 = vmul.f32 %v526_v8, %v526_v8  ;;  %v265_v31 = vadd.f32 %v264_v21, %v263_v27 }
 0x126   :  { %v140_v59 = vmul.f32 %v509_v43, %v81_v32  ;;  %419 = vpow2.f32 %v176_v60 }
 0x127   :  { %v266_v28 = vsel %vm262_vm0, %v232_v17, 0.0 }
 0x128   :  { %v178_v63 = vmul.f32 1.442695, %v140_v59  ;;  %v531_v13 = vpop.eup %415 }
 0x129   :  { %v82_v34 = vpop.trf.xlu1  ;;  %v233_v22 = vmul.f32 %v531_v13, %v531_v13 }
 0x12a   :  { %v141_v61 = vmul.f32 %v509_v43, %v82_v34  ;;  %421 = vpow2.f32 %v178_v63 }
 0x12b   :  { %v268_v34 = vsel %vm262_vm0, %v233_v22, 0.0 }
 0x12c   :  { %v180_v1 = vmul.f32 1.442695, %v141_v61  ;;  %v538_v18 = vpop.eup %417 }
 0x12d   :  { %v83_v36 = vpop.trf.xlu1  ;;  %v234_v29 = vmul.f32 %v538_v18, %v538_v18 }
 0x12e   :  { %v142_v0 = vmul.f32 %v509_v43, %v83_v36  ;;  %423 = vpow2.f32 %v180_v1 }
 0x12f   :  { %v270_v41 = vsel %vm262_vm0, %v234_v29, 0.0 }
 0x130   :  { %v182_v5 = vmul.f32 1.442695, %v142_v0  ;;  %v544_v24 = vpop.eup %419 }
 0x131   :  { %v84_v37 = vpop.trf.xlu1  ;;  %v235_v35 = vmul.f32 %v544_v24, %v544_v24 }
 0x132   :  { %v143_v2 = vmul.f32 %v509_v43, %v84_v37  ;;  %425 = vpow2.f32 %v182_v5 }
 0x133   :  { %v272_v48 = vsel %vm262_vm0, %v235_v35, 0.0 }
 0x134   :  { %v184_v9 = vmul.f32 1.442695, %v143_v2  ;;  %v551_v30 = vpop.eup %421 }
 0x135   :  { %v85_v38 = vpop.trf.xlu1 }
 0x136   :  { %v144_v6 = vmul.f32 %v509_v43, %v85_v38  ;;  %427 = vpow2.f32 %v184_v9  ;;  %v267_v38 = vadd.f32 %v266_v28, %v265_v31 }
 0x138   :  { %v186_v14 = vmul.f32 1.442695, %v144_v6  ;;  %v557_v37 = vpop.eup %423  ;;  %v269_v45 = vadd.f32 %v268_v34, %v267_v38 }
 0x139   :  { %v86_v39 = vpop.trf.xlu1  ;;  %v237_v49 = vmul.f32 %v557_v37, %v557_v37 }
 0x13a   :  { %v145_v10 = vmul.f32 %v509_v43, %v86_v39  ;;  %429 = vpow2.f32 %v186_v14 }
 0x13b   :  { %v276_v61 = vsel %vm262_vm0, %v237_v49, 0.0 }
 0x13c   :  { %v188_v19 = vmul.f32 1.442695, %v145_v10 }
 0x13d   :  { %v87_v42 = vpop.trf.xlu1 }
 0x13e   :  { %v146_v15 = vmul.f32 %v509_v43, %v87_v42  ;;  %431 = vpow2.f32 %v188_v19  ;;  %v236_v42 = vmul.f32 %v551_v30, %v551_v30 }
 0x140   :  { %v190_v25 = vmul.f32 1.442695, %v146_v15  ;;  %v274_v55 = vsel %vm262_vm0, %v236_v42, 0.0 }
 0x141   :  { %v88_v44 = vpop.trf.xlu1 }
 0x142   :  { %v147_v20 = vmul.f32 %v509_v43, %v88_v44  ;;  %433 = vpow2.f32 %v190_v25  ;;  %v563_v44 = vpop.eup %425 }
 0x143   :  { %v569_v51 = vpop.eup %427  ;;  %v238_v56 = vmul.f32 %v563_v44, %v563_v44 }
 0x144   :  { %v192_v32 = vmul.f32 1.442695, %v147_v20 }
 0x145   :  { %v89_v47 = vpop.trf.xlu1  ;;  %v278_v5 = vsel %vm262_vm0, %v238_v56, 0.0 }
 0x146   :  { %v148_v26 = vmul.f32 %v509_v43, %v89_v47  ;;  %435 = vpow2.f32 %v192_v32 }
 0x148   :  { %v194_v39 = vmul.f32 1.442695, %v148_v26 }
 0x149   :  { %v90_v52 = vpop.trf.xlu1 }
 0x14a   :  { %v149_v33 = vmul.f32 %v509_v43, %v90_v52  ;;  %v271_v52 = vadd.f32 %v270_v41, %v269_v45  ;;  %437 = vpow2.f32 %v194_v39 }
 0x14c   :  { %v196_v46 = vmul.f32 1.442695, %v149_v33  ;;  %v273_v58 = vadd.f32 %v272_v48, %v271_v52 }
 0x14d   :  { %v107_v57 = vpop.trf.xlu1 }
 0x14e   :  { %v150_v40 = vmul.f32 %v509_v43, %v107_v57  ;;  %v575_v57 = vpop.eup %429  ;;  %439 = vpow2.f32 %v196_v46  ;;  %v275_v1 = vadd.f32 %v274_v55, %v273_v58 }
 0x14f   :  { %v581_v0 = vpop.eup %431  ;;  %v240_v6 = vmul.f32 %v575_v57, %v575_v57 }
 0x150   :  { %v198_v53 = vmul.f32 1.442695, %v150_v40  ;;  %v587_v9 = vpop.eup %433  ;;  %v277_v10 = vadd.f32 %v276_v61, %v275_v1  ;;  %v241_v15 = vmul.f32 %v581_v0, %v581_v0 }
 0x151   :  { %v108_v62 = vpop.trf.xlu1  ;;  %v593_v17 = vpop.eup %435  ;;  %v282_v22 = vsel %vm262_vm0, %v240_v6, 0.0 }
 0x152   :  { %v151_v47 = vmul.f32 %v509_v43, %v108_v62  ;;  %v239_v62 = vmul.f32 %v569_v51, %v569_v51  ;;  %441 = vpow2.f32 %v198_v53  ;;  %v279_v19 = vadd.f32 %v278_v5, %v277_v10 }
 0x153   :  { %v284_v29 = vsel %vm262_vm0, %v241_v15, 0.0  ;;  %v243_v31 = vmul.f32 %v593_v17, %v593_v17 }
 0x154   :  { %v200_v59 = vmul.f32 1.442695, %v151_v47  ;;  %v280_v14 = vsel %vm262_vm0, %v239_v62, 0.0  ;;  %v599_v25 = vpop.eup %437 }
 0x155   :  { %v109_v3 = vpop.trf.xlu1  ;;  %v281_v26 = vadd.f32 %v280_v14, %v279_v19  ;;  %v244_v39 = vmul.f32 %v599_v25, %v599_v25  ;;  %v288_v46 = vsel %vm262_vm0, %v243_v31, 0.0 }
 0x156   :  { %v152_v54 = vmul.f32 %v509_v43, %v109_v3  ;;  %443 = vpow2.f32 %v200_v59 }
 0x157   :  { %v283_v34 = vadd.f32 %v282_v22, %v281_v26 }
 0x158   :  { %v202_v2 = vmul.f32 1.442695, %v152_v54  ;;  %v605_v33 = vpop.eup %439  ;;  %v290_v54 = vsel %vm262_vm0, %v244_v39, 0.0 }
 0x159   :  { %v110_v12 = vpop.trf.xlu1  ;;  %v285_v41 = vadd.f32 %v284_v29, %v283_v34  ;;  %v245_v47 = vmul.f32 %v605_v33, %v605_v33 }
 0x15a   :  { %v153_v60 = vmul.f32 %v509_v43, %v110_v12  ;;  %445 = vpow2.f32 %v202_v2 }
 0x15c   :  { %v204_v11 = vmul.f32 1.442695, %v153_v60  ;;  %v611_v40 = vpop.eup %441  ;;  %v292_v60 = vsel %vm262_vm0, %v245_v47, 0.0 }
 0x15d   :  { %v111_v23 = vpop.trf.xlu1  ;;  %v246_v55 = vmul.f32 %v611_v40, %v611_v40 }
 0x15e   :  { %v154_v3 = vmul.f32 %v509_v43, %v111_v23  ;;  %v242_v23 = vmul.f32 %v587_v9, %v587_v9  ;;  %447 = vpow2.f32 %v204_v11 }
 0x15f   :  { %v294_v5 = vsel %vm262_vm0, %v246_v55, 0.0 }
 0x160   :  { %v206_v20 = vmul.f32 1.442695, %v154_v3  ;;  %v286_v38 = vsel %vm262_vm0, %v242_v23, 0.0  ;;  %v617_v49 = vpop.eup %443 }
 0x161   :  { %v112_v36 = vpop.trf.xlu1  ;;  %v247_v61 = vmul.f32 %v617_v49, %v617_v49 }
 0x162   :  { %v155_v12 = vmul.f32 %v509_v43, %v112_v36  ;;  %449 = vpow2.f32 %v206_v20 }
 0x163   :  { %v296_v14 = vsel %vm262_vm0, %v247_v61, 0.0 }
 0x164   :  { %v208_v27 = vmul.f32 1.442695, %v155_v12  ;;  %v623_v56 = vpop.eup %445 }
 0x165   :  { %v113_v50 = vpop.trf.xlu1  ;;  %v248_v6 = vmul.f32 %v623_v56, %v623_v56 }
 0x166   :  { %v156_v21 = vmul.f32 %v509_v43, %v113_v50  ;;  %451 = vpow2.f32 %v208_v27  ;;  %v287_v50 = vadd.f32 %v286_v38, %v285_v41 }
 0x167   :  { %v298_v22 = vsel %vm262_vm0, %v248_v6, 0.0 }
 0x168   :  { %v210_v35 = vmul.f32 1.442695, %v156_v21  ;;  %v289_v58 = vadd.f32 %v288_v46, %v287_v50 }
 0x169   :  { %v114_v63 = vpop.trf.xlu1 }
 0x16a   :  { %v157_v28 = vmul.f32 %v509_v43, %v114_v63  ;;  %453 = vpow2.f32 %v210_v35  ;;  %v628_v63 = vpop.eup %447  ;;  %v291_v1 = vadd.f32 %v290_v54, %v289_v58 }
 0x16b   :  { %v249_v15 = vmul.f32 %v628_v63, %v628_v63 }
 0x16c   :  { %v212_v42 = vmul.f32 1.442695, %v157_v28  ;;  %v634_v10 = vpop.eup %449  ;;  %v293_v11 = vadd.f32 %v292_v60, %v291_v1 }
 0x16d   :  { %v115_v16 = vpop.trf.xlu1  ;;  %v250_v23 = vmul.f32 %v634_v10, %v634_v10  ;;  %v300_v29 = vsel %vm262_vm0, %v249_v15, 0.0 }
 0x16e   :  { %v158_v36 = vmul.f32 %v509_v43, %v115_v16  ;;  %455 = vpow2.f32 %v212_v42  ;;  %v295_v20 = vadd.f32 %v294_v5, %v293_v11 }
 0x16f   :  { %v302_v38 = vsel %vm262_vm0, %v250_v23, 0.0 }
 0x170   :  { %v214_v52 = vmul.f32 1.442695, %v158_v36  ;;  %v639_v19 = vpop.eup %451  ;;  %v297_v27 = vadd.f32 %v296_v14, %v295_v20 }
 0x171   :  { %v116_v32 = vpop.trf.xlu1  ;;  %v251_v31 = vmul.f32 %v639_v19, %v639_v19 }
 0x172   :  { %v159_v45 = vmul.f32 %v509_v43, %v116_v32  ;;  %457 = vpow2.f32 %v214_v52  ;;  %v299_v35 = vadd.f32 %v298_v22, %v297_v27 }
 0x173   :  { %v304_v46 = vsel %vm262_vm0, %v251_v31, 0.0 }
 0x174   :  { %v216_v59 = vmul.f32 1.442695, %v159_v45  ;;  %v645_v26 = vpop.eup %453  ;;  %v301_v42 = vadd.f32 %v300_v29, %v299_v35 }
 0x175   :  { %v117_v48 = vpop.trf.xlu1  ;;  %v252_v39 = vmul.f32 %v645_v26, %v645_v26 }
 0x176   :  { %v160_v53 = vmul.f32 %v509_v43, %v117_v48  ;;  %459 = vpow2.f32 %v216_v59  ;;  %v303_v52 = vadd.f32 %v302_v38, %v301_v42 }
 0x177   :  { %v306_v54 = vsel %vm262_vm0, %v252_v39, 0.0 }
 0x178   :  { %v218_v2 = vmul.f32 1.442695, %v160_v53  ;;  %v650_v34 = vpop.eup %455  ;;  %v305_v59 = vadd.f32 %v304_v46, %v303_v52 }
 0x179   :  { %v118_v62 = vpop.trf.xlu1  ;;  %v253_v47 = vmul.f32 %v650_v34, %v650_v34 }
 0x17a   :  { %v161_v3 = vmul.f32 %v509_v43, %v118_v62  ;;  %461 = vpow2.f32 %v218_v2 }
 0x17b   :  { %v308_v61 = vsel %vm262_vm0, %v253_v47, 0.0 }
 0x17c   :  { %v220_v12 = vmul.f32 1.442695, %v161_v3  ;;  %v656_v41 = vpop.eup %457  ;;  %v307_v3 = vadd.f32 %v306_v54, %v305_v59 }
 0x17d   :  { %v119_v16 = vpop.trf.xlu1  ;;  %v254_v55 = vmul.f32 %v656_v41, %v656_v41 }
 0x17e   :  { %v162_v21 = vmul.f32 %v509_v43, %v119_v16  ;;  %463 = vpow2.f32 %v220_v12  ;;  %v309_v14 = vadd.f32 %v308_v61, %v307_v3 }
 0x17f   :  { %v310_v6 = vsel %vm262_vm0, %v254_v55, 0.0 }
 0x180   :  { %v222_v28 = vmul.f32 1.442695, %v162_v21  ;;  %v661_v50 = vpop.eup %459  ;;  %v311_v21 = vadd.f32 %v310_v6, %v309_v14 }
 0x181   :  { %v120_v32 = vpop.trf.xlu1  ;;  %v255_v62 = vmul.f32 %v661_v50, %v661_v50 }
 0x182   :  { %465 = vpow2.f32 %v222_v28  ;;  %v163_v36 = vmul.f32 %v509_v43, %v120_v32 }
 0x183   :  { %v312_v16 = vsel %vm262_vm0, %v255_v62, 0.0 }
 0x184   :  { %v224_v45 = vmul.f32 1.442695, %v163_v36  ;;  %v667_v58 = vpop.eup %461  ;;  %v313_v27 = vadd.f32 %v312_v16, %v311_v21 }
 0x185   :  { %v121_v48 = vpop.trf.xlu1  ;;  %v256_v11 = vmul.f32 %v667_v58, %v667_v58 }
 0x186   :  { %467 = vpow2.f32 %v224_v45  ;;  %v164_v53 = vmul.f32 %v509_v43, %v121_v48 }
 0x187   :  { %v314_v22 = vsel %vm262_vm0, %v256_v11, 0.0 }
 0x188   :  { %v226_v60 = vmul.f32 1.442695, %v164_v53  ;;  %v672_v2 = vpop.eup %463  ;;  %v315_v31 = vadd.f32 %v314_v22, %v313_v27 }
 0x189   :  { %v122_v1 = vpop.trf.xlu1  ;;  %v257_v20 = vmul.f32 %v672_v2, %v672_v2 }
 0x18a   :  { %469 = vpow2.f32 %v226_v60  ;;  %v165_v5 = vmul.f32 %v509_v43, %v122_v1 }
 0x18b   :  { %v316_v28 = vsel %vm262_vm0, %v257_v20, 0.0 }
 0x18c   :  { %v678_v12 = vpop.eup %465  ;;  %v228_v15 = vmul.f32 1.442695, %v165_v5  ;;  %v317_v36 = vadd.f32 %v316_v28, %v315_v31 }
 0x18d   :  { %v258_v43 = vmul.f32 %v678_v12, %v678_v12 }
 0x18e   :  { %471 = vpow2.f32 %v228_v15 }
 0x18f   :  { %v318_v32 = vsel %vm262_vm0, %v258_v43, 0.0 }
 0x190   :  { %v686_v23 = vpop.eup %467  ;;  %v319_v42 = vadd.f32 %v318_v32, %v317_v36 }
 0x191   :  { %v259_v29 = vmul.f32 %v686_v23, %v686_v23 }
 0x193   :  { %v320_v38 = vsel %vm262_vm0, %v259_v29, 0.0 }
 0x194   :  { %v692_v35 = vpop.eup %469  ;;  %v321_v47 = vadd.f32 %v320_v38, %v319_v42 }
 0x195   :  { %v260_v39 = vmul.f32 %v692_v35, %v692_v35 }
 0x197   :  { %v322_v45 = vsel %vm262_vm0, %v260_v39, 0.0 }
 0x198   :  { %v698_v46 = vpop.eup %471  ;;  %v323_v52 = vadd.f32 %v322_v45, %v321_v47 }
 0x199   :  { %v261_v48 = vmul.f32 %v698_v46, %v698_v46 }
 0x19b   :  { %v324_v53 = vsel %vm262_vm0, %v261_v48, 0.0 }
 0x19c   :  { %v325_v54 = vadd.f32 %v324_v53, %v323_v52 }
 0x19e   :  { %v326_v55 = vrot.slane %v325_v54, 4 }
 0x1a0   :  { %v327_v59 = vadd.f32 %v326_v55, %v325_v54 }
 0x1a2   :  { %v328_v60 = vrot.slane %v327_v59, 2 }
 0x1a4   :  { %v329_v61 = vadd.f32 %v328_v60, %v327_v59 }
 0x1a6   :  { %v330_v62 = vrot.slane %v329_v61, 1 }
 0x1a8   :  { %v331_v1 = vadd.f32 %v330_v62, %v329_v61 }
 0x1aa   :  { %473 = vrsqrt.f32 %v331_v1 }
 0x1b4   :  { %v474_v3 = vpop.eup %473 }
 0x1b5   :  { %v333_v5 = vmul.f32 %v474_v3, %v524_v7  ;;  %v334_v6 = vmul.f32 %v474_v3, %v521_v4  ;;  %v335_v11 = vmul.f32 %v474_v3, %v526_v8  ;;  %v336_v14 = vmul.f32 %v474_v3, %v531_v13 }
 0x1b6   :  { %v337_v15 = vmul.f32 %v474_v3, %v538_v18  ;;  %v338_v16 = vmul.f32 %v474_v3, %v544_v24  ;;  %v339_v20 = vmul.f32 %v474_v3, %v551_v30  ;;  %v340_v21 = vmul.f32 %v474_v3, %v557_v37 }
 0x1b7   :  { %v341_v22 = vmul.f32 %v474_v3, %v563_v44  ;;  %v342_v43 = vmul.f32 %v474_v3, %v569_v51  ;;  %v343_v7 = vmul.f32 %v474_v3, %v575_v57  ;;  %v344_v4 = vmul.f32 %v474_v3, %v581_v0  ;;  %365 = vst.msk [vmem:[%s866_s3] sm:$0xff] %vm262_vm0, %v333_v5 }
 0x1b8   :  { %366 = vst.msk [vmem:[%s866_s3 + $0x8] sm:$0xff] %vm262_vm0, %v334_v6  ;;  %367 = vst.msk [vmem:[%s866_s3 + $0x10] sm:$0xff] %vm262_vm0, %v335_v11  ;;  %v345_v8 = vmul.f32 %v474_v3, %v587_v9  ;;  %v346_v13 = vmul.f32 %v474_v3, %v593_v17  ;;  %v347_v18 = vmul.f32 %v474_v3, %v599_v25 }
 0x1b9   :  { %368 = vst.msk [vmem:[%s866_s3 + $0x18] sm:$0xff] %vm262_vm0, %v336_v14  ;;  %v348_v24 = vmul.f32 %v474_v3, %v605_v33  ;;  %369 = vst.msk [vmem:[%s866_s3 + $0x20] sm:$0xff] %vm262_vm0, %v337_v15  ;;  %v349_v30 = vmul.f32 %v474_v3, %v611_v40  ;;  %v350_v37 = vmul.f32 %v474_v3, %v617_v49 }
 0x1ba   :  { %370 = vst.msk [vmem:[%s866_s3 + $0x28] sm:$0xff] %vm262_vm0, %v338_v16  ;;  %371 = vst.msk [vmem:[%s866_s3 + $0x30] sm:$0xff] %vm262_vm0, %v339_v20  ;;  %v351_v44 = vmul.f32 %v474_v3, %v623_v56  ;;  %v352_v51 = vmul.f32 %v474_v3, %v628_v63  ;;  %v353_v57 = vmul.f32 %v474_v3, %v634_v10 }
 0x1bb   :  { %372 = vst.msk [vmem:[%s866_s3 + $0x38] sm:$0xff] %vm262_vm0, %v340_v21  ;;  %373 = vst.msk [vmem:[%s866_s3 + $0x40] sm:$0xff] %vm262_vm0, %v341_v22  ;;  %v354_v0 = vmul.f32 %v474_v3, %v639_v19  ;;  %v355_v9 = vmul.f32 %v474_v3, %v645_v26  ;;  %v356_v17 = vmul.f32 %v474_v3, %v650_v34 }
 0x1bc   :  { %374 = vst.msk [vmem:[%s866_s3 + $0x48] sm:$0xff] %vm262_vm0, %v342_v43  ;;  %375 = vst.msk [vmem:[%s866_s3 + $0x50] sm:$0xff] %vm262_vm0, %v343_v7  ;;  %v357_v25 = vmul.f32 %v474_v3, %v656_v41  ;;  %v358_v33 = vmul.f32 %v474_v3, %v661_v50  ;;  %v359_v40 = vmul.f32 %v474_v3, %v667_v58 }
 0x1bd   :  { %376 = vst.msk [vmem:[%s866_s3 + $0x58] sm:$0xff] %vm262_vm0, %v344_v4  ;;  %377 = vst.msk [vmem:[%s866_s3 + $0x60] sm:$0xff] %vm262_vm0, %v345_v8  ;;  %v360_v49 = vmul.f32 %v474_v3, %v672_v2  ;;  %v361_v56 = vmul.f32 %v474_v3, %v678_v12  ;;  %v362_v63 = vmul.f32 %v474_v3, %v686_v23 }
 0x1be   :  { %378 = vst.msk [vmem:[%s866_s3 + $0x68] sm:$0xff] %vm262_vm0, %v346_v13  ;;  %379 = vst.msk [vmem:[%s866_s3 + $0x70] sm:$0xff] %vm262_vm0, %v347_v18  ;;  %v363_v10 = vmul.f32 %v474_v3, %v692_v35  ;;  %v364_v19 = vmul.f32 %v474_v3, %v698_v46 }
 0x1bf   :  { %380 = vst.msk [vmem:[%s866_s3 + $0x78] sm:$0xff] %vm262_vm0, %v348_v24  ;;  %381 = vst.msk [vmem:[%s866_s3 + $0x80] sm:$0xff] %vm262_vm0, %v349_v30 }
 0x1c0   :  { %382 = vst.msk [vmem:[%s866_s3 + $0x88] sm:$0xff] %vm262_vm0, %v350_v37  ;;  %383 = vst.msk [vmem:[%s866_s3 + $0x90] sm:$0xff] %vm262_vm0, %v351_v44 }
 0x1c1   :  { %384 = vst.msk [vmem:[%s866_s3 + $0x98] sm:$0xff] %vm262_vm0, %v352_v51  ;;  %385 = vst.msk [vmem:[%s866_s3 + $0xa0] sm:$0xff] %vm262_vm0, %v353_v57 }
 0x1c2   :  { %386 = vst.msk [vmem:[%s866_s3 + $0xa8] sm:$0xff] %vm262_vm0, %v354_v0  ;;  %387 = vst.msk [vmem:[%s866_s3 + $0xb0] sm:$0xff] %vm262_vm0, %v355_v9 }
 0x1c3   :  { %388 = vst.msk [vmem:[%s866_s3 + $0xb8] sm:$0xff] %vm262_vm0, %v356_v17  ;;  %389 = vst.msk [vmem:[%s866_s3 + $0xc0] sm:$0xff] %vm262_vm0, %v357_v25 }
 0x1c4   :  { %390 = vst.msk [vmem:[%s866_s3 + $0xc8] sm:$0xff] %vm262_vm0, %v358_v33  ;;  %391 = vst.msk [vmem:[%s866_s3 + $0xd0] sm:$0xff] %vm262_vm0, %v359_v40 }
 0x1c5   :  { %392 = vst.msk [vmem:[%s866_s3 + $0xd8] sm:$0xff] %vm262_vm0, %v360_v49  ;;  %393 = vst.msk [vmem:[%s866_s3 + $0xe0] sm:$0xff] %vm262_vm0, %v361_v56 }
 0x1c6   :  { %394 = vst.msk [vmem:[%s866_s3 + $0xe8] sm:$0xff] %vm262_vm0, %v362_v63  ;;  %395 = vst.msk [vmem:[%s866_s3 + $0xf0] sm:$0xff] %vm262_vm0, %v363_v10 }
 0x1c7   :  { %396 = vst.msk [vmem:[%s866_s3 + $0xf8] sm:$0xff] %vm262_vm0, %v364_v19 }

</bundles_post_ra>
